<compile_context>
chip_gen: v7x
topology: tpu7x:2x2x1
jax: 0.10.0
libtpu: 0.0.40
codegen_flags: <defaults>
</compile_context>

<pallas_src>
import functools

import jax
import jax.numpy as jnp
from jax.experimental import pallas as pl
from jax.experimental.pallas import tpu as pltpu

LANE = 128
SUBLANE = 8


def _round_up(x, m):
    return (x + m - 1) // m * m


def mlp_kernel(x_ref, w1_ref, b1_ref, w2_ref, b2_ref, w34_ref, b34_ref, o_ref,
               *, compute_dtype):
    # fc1 + relu (bias add / relu in f32; only the MXU operands are cast)
    x = x_ref[...].astype(compute_dtype)
    h = jnp.dot(x, w1_ref[...], preferred_element_type=jnp.float32)
    h = jnp.maximum(h + b1_ref[...], 0.0)

    # (dropout = identity in eval)

    # fc2 + relu
    h = jnp.dot(h.astype(compute_dtype), w2_ref[...],
                preferred_element_type=jnp.float32)
    h = jnp.maximum(h + b2_ref[...], 0.0)

    # fused fc3 + fc4 (no activation between them; W34/b34 precomputed)
    out = jnp.dot(h.astype(compute_dtype), w34_ref[...],
                  preferred_element_type=jnp.float32)
    out = out + b34_ref[...]

    o_ref[...] = out.astype(o_ref.dtype)


def mlp_forward(x, params, *, compute_dtype=jnp.float32, tile_b=1024):
    """x: (B, input_size) f32. params: dict of (in,out) weights + (1,out) biases."""
    B, f_in = x.shape
    hidden = params["w1"].shape[1]
    out_size = params["w4"].shape[1]
    out_pad = _round_up(out_size, LANE)  # lane-dense output slab width

    # ---- fold fc3 & fc4 into one linear:  (h@W3+b3)@W4+b4 = h@(W3@W4) + (b3@W4+b4)
    w34 = params["w3"] @ params["w4"]
    b34 = params["b3"] @ params["w4"] + params["b4"]
    # zero-pad the fused output dim to a lane-dense width (unmasked stores)
    w34 = jnp.pad(w34, ((0, 0), (0, out_pad - out_size)))
    b34 = jnp.pad(b34, ((0, 0), (0, out_pad - out_size)))

    # MXU operands cast once in the wrapper; biases stay f32 for the VPU.
    w1 = params["w1"].astype(compute_dtype)
    w2 = params["w2"].astype(compute_dtype)
    w34 = w34.astype(compute_dtype)
    b1 = params["b1"].astype(jnp.float32)
    b2 = params["b2"].astype(jnp.float32)
    b34 = b34.astype(jnp.float32)

    # ---- batch tiling: biggest tile up to `tile_b`, sublane-aligned
    tile_b = max(SUBLANE, min(tile_b, _round_up(B, SUBLANE)))
    b_pad = _round_up(B, tile_b)
    if b_pad != B:
        x = jnp.pad(x, ((0, b_pad - B), (0, 0)))
    grid = (b_pad // tile_b,)

    def resident(arr):  # weights/biases: same block every grid step -> VMEM-resident
        return pl.BlockSpec(arr.shape, lambda i, _nd=arr.ndim: (0,) * _nd)

    in_specs = [
        pl.BlockSpec((tile_b, f_in), lambda i: (i, 0)),   # x: streamed over batch
        resident(w1), resident(b1),
        resident(w2), resident(b2),
        resident(w34), resident(b34),
    ]
    out_specs = pl.BlockSpec((tile_b, out_pad), lambda i: (i, 0))

    flops = 2 * b_pad * (f_in * hidden + hidden * hidden + hidden * out_pad)
    bytes_accessed = (
        b_pad * f_in * 4
        + sum(int(a.size) * a.dtype.itemsize for a in (w1, b1, w2, b2, w34, b34))
        + b_pad * out_pad * 4
    )

    out_padded = pl.pallas_call(
        functools.partial(mlp_kernel, compute_dtype=compute_dtype),
        out_shape=jax.ShapeDtypeStruct((b_pad, out_pad), jnp.float32),
        grid=grid,
        in_specs=in_specs,
        out_specs=out_specs,
        compiler_params=pltpu.CompilerParams(
            dimension_semantics=("parallel",),      # megacore-shardable on v7x
            vmem_limit_bytes=32 * 1024 * 1024,      # explicit budget (safe on v5e/v6e/v7x)
        ),
        cost_estimate=pl.CostEstimate(
            flops=flops, transcendentals=0, bytes_accessed=bytes_accessed),
    )(x, w1, b1, w2, b2, w34, b34)

    return out_padded[:B, :out_size]


def init_params(key, input_size=5, output_size=3, hidden_size=32):
    """Deterministic init mimicking nn.Linear's U(-1/sqrt(fan_in), 1/sqrt(fan_in))."""
    dims = [(input_size, hidden_size),
            (hidden_size, hidden_size),
            (hidden_size, hidden_size),
            (hidden_size, output_size)]
    params = {}
    keys = jax.random.split(key, 2 * len(dims))
    for i, (fan_in, fan_out) in enumerate(dims):
        bound = 1.0 / (fan_in ** 0.5)
        params[f"w{i + 1}"] = jax.random.uniform(
            keys[2 * i], (fan_in, fan_out), jnp.float32, -bound, bound)
        params[f"b{i + 1}"] = jax.random.uniform(
            keys[2 * i + 1], (1, fan_out), jnp.float32, -bound, bound)
    return params


def mlp_reference(x, params):
    h = jnp.maximum(x @ params["w1"] + params["b1"], 0.0)
    h = jnp.maximum(h @ params["w2"] + params["b2"], 0.0)
    h = h @ params["w3"] + params["b3"]
    return h @ params["w4"] + params["b4"]


if __name__ == "__main__":
    key = jax.random.PRNGKey(0)
    k_param, k_x1, k_x2 = jax.random.split(key, 3)

    input_size, output_size, hidden_size = 5, 3, 32
    params = init_params(k_param, input_size, output_size, hidden_size)

    # --- small batch (single grid step), f32 operands: exact module semantics ---
    x = jax.random.normal(k_x1, (8, input_size), jnp.float32)
    out = jax.block_until_ready(mlp_forward(x, params))
    ref = mlp_reference(x, params)
    assert out.shape == (8, output_size), out.shape
    assert jnp.allclose(out, ref, atol=1e-4, rtol=1e-4), "f32 mismatch vs reference"

    # --- larger, non-divisible batch exercising multiple pipelined grid steps ---
    x_big = jax.random.normal(k_x2, (300, input_size), jnp.float32)
    out_big = jax.block_until_ready(mlp_forward(x_big, params, tile_b=128))
    ref_big = mlp_reference(x_big, params)
    assert out_big.shape == (300, output_size), out_big.shape
    assert jnp.allclose(out_big, ref_big, atol=1e-4, rtol=1e-4), "tiled f32 mismatch"

    # --- bf16 MXU operands / f32 accumulate (v6e/v7x fast path) ---
    out_bf16 = jax.block_until_ready(
        mlp_forward(x_big, params, compute_dtype=jnp.bfloat16, tile_b=128))
    assert jnp.allclose(out_bf16, ref_big, atol=1.5e-1, rtol=5e-2), "bf16 mismatch"

    print("KERNEL_OK")
</pallas_src>

<mosaic_0001>
module attributes {stable_mosaic.version = 11 : i64} {
  func.func @mlp_kernel(%arg0: i32, %arg1: memref<8x5xf32, #tpu.memory_space<vmem>>, %arg2: memref<5x32xf32, #tpu.memory_space<vmem>>, %arg3: memref<1x32xf32, #tpu.memory_space<vmem>>, %arg4: memref<32x32xf32, #tpu.memory_space<vmem>>, %arg5: memref<1x32xf32, #tpu.memory_space<vmem>>, %arg6: memref<32x128xf32, #tpu.memory_space<vmem>>, %arg7: memref<1x128xf32, #tpu.memory_space<vmem>>, %arg8: memref<8x128xf32, #tpu.memory_space<vmem>>) attributes {dimension_semantics = [#tpu.dimension_semantics<parallel>], iteration_bounds = array<i64: 1>, scalar_prefetch = 0 : i64, scratch_operands = 0 : i64, tpu.core_type = #tpu.core_type<tc>, window_params = [{transform_indices = @transform_0, window_bounds = array<i64: 8, 5>}, {pipeline_mode = #tpu.pipeline_mode<synchronous>, transform_indices = @transform_1, window_bounds = array<i64: 5, 32>}, {pipeline_mode = #tpu.pipeline_mode<synchronous>, transform_indices = @transform_2, window_bounds = array<i64: 1, 32>}, {pipeline_mode = #tpu.pipeline_mode<synchronous>, transform_indices = @transform_3, window_bounds = array<i64: 32, 32>}, {pipeline_mode = #tpu.pipeline_mode<synchronous>, transform_indices = @transform_4, window_bounds = array<i64: 1, 32>}, {pipeline_mode = #tpu.pipeline_mode<synchronous>, transform_indices = @transform_5, window_bounds = array<i64: 32, 128>}, {pipeline_mode = #tpu.pipeline_mode<synchronous>, transform_indices = @transform_6, window_bounds = array<i64: 1, 128>}, {transform_indices = @transform_7, window_bounds = array<i64: 8, 128>}]} {
    %c0 = arith.constant 0 : index
    %c0_0 = arith.constant 0 : index
    %0 = vector.load %arg1[%c0, %c0_0] : memref<8x5xf32, #tpu.memory_space<vmem>>, vector<8x5xf32>
    %c0_1 = arith.constant 0 : index
    %c0_2 = arith.constant 0 : index
    %1 = vector.load %arg2[%c0_1, %c0_2] : memref<5x32xf32, #tpu.memory_space<vmem>>, vector<5x32xf32>
    %cst = arith.constant dense<0.000000e+00> : vector<8x32xf32>
    %2 = tpu.matmul %0, %1, %cst {dimension_numbers = #tpu.dot_dimension_numbers<[1], [0], [0], [1], [0, 0, 1, 1], [], []>} : vector<8x5xf32>, vector<5x32xf32>, vector<8x32xf32> -> vector<8x32xf32>
    %c0_3 = arith.constant 0 : index
    %c0_4 = arith.constant 0 : index
    %3 = vector.load %arg3[%c0_3, %c0_4] : memref<1x32xf32, #tpu.memory_space<vmem>>, vector<1x32xf32>
    %4 = vector.broadcast %3 : vector<1x32xf32> to vector<8x32xf32>
    %5 = arith.addf %2, %4 : vector<8x32xf32>
    %cst_5 = arith.constant 0.000000e+00 : f32
    %6 = vector.broadcast %cst_5 : f32 to vector<8x32xf32>
    %7 = arith.maximumf %5, %6 : vector<8x32xf32>
    %c0_6 = arith.constant 0 : index
    %c0_7 = arith.constant 0 : index
    %8 = vector.load %arg4[%c0_6, %c0_7] : memref<32x32xf32, #tpu.memory_space<vmem>>, vector<32x32xf32>
    %cst_8 = arith.constant dense<0.000000e+00> : vector<8x32xf32>
    %9 = tpu.matmul %7, %8, %cst_8 {dimension_numbers = #tpu.dot_dimension_numbers<[1], [0], [0], [1], [0, 0, 1, 1], [], []>} : vector<8x32xf32>, vector<32x32xf32>, vector<8x32xf32> -> vector<8x32xf32>
    %c0_9 = arith.constant 0 : index
    %c0_10 = arith.constant 0 : index
    %10 = vector.load %arg5[%c0_9, %c0_10] : memref<1x32xf32, #tpu.memory_space<vmem>>, vector<1x32xf32>
    %11 = vector.broadcast %10 : vector<1x32xf32> to vector<8x32xf32>
    %12 = arith.addf %9, %11 : vector<8x32xf32>
    %cst_11 = arith.constant 0.000000e+00 : f32
    %13 = vector.broadcast %cst_11 : f32 to vector<8x32xf32>
    %14 = arith.maximumf %12, %13 : vector<8x32xf32>
    %c0_12 = arith.constant 0 : index
    %c0_13 = arith.constant 0 : index
    %15 = vector.load %arg6[%c0_12, %c0_13] : memref<32x128xf32, #tpu.memory_space<vmem>>, vector<32x128xf32>
    %cst_14 = arith.constant dense<0.000000e+00> : vector<8x128xf32>
    %16 = tpu.matmul %14, %15, %cst_14 {dimension_numbers = #tpu.dot_dimension_numbers<[1], [0], [0], [1], [0, 0, 1, 1], [], []>} : vector<8x32xf32>, vector<32x128xf32>, vector<8x128xf32> -> vector<8x128xf32>
    %c0_15 = arith.constant 0 : index
    %c0_16 = arith.constant 0 : index
    %17 = vector.load %arg7[%c0_15, %c0_16] : memref<1x128xf32, #tpu.memory_space<vmem>>, vector<1x128xf32>
    %18 = vector.broadcast %17 : vector<1x128xf32> to vector<8x128xf32>
    %19 = arith.addf %16, %18 : vector<8x128xf32>
    %c0_17 = arith.constant 0 : index
    %c0_18 = arith.constant 0 : index
    %20 = vector.load %arg8[%c0_17, %c0_18] : memref<8x128xf32, #tpu.memory_space<vmem>>, vector<8x128xf32>
    tpu.vector_store %arg8[%c0_17, %c0_18], %19 {strides = array<i32>} : memref<8x128xf32, #tpu.memory_space<vmem>>, vector<8x128xf32>,
    return
  }
  func.func @transform_0(%arg0: i32) -> (i32, i32) {
    %c0_i32 = arith.constant 0 : i32
    %c0_i32_0 = arith.constant 0 : i32
    return %arg0, %c0_i32 : i32, i32
  }
  func.func @transform_1(%arg0: i32) -> (i32, i32) {
    %c0_i32 = arith.constant 0 : i32
    %c0_i32_0 = arith.constant 0 : i32
    %c0_i32_1 = arith.constant 0 : i32
    return %c0_i32, %c0_i32_0 : i32, i32
  }
  func.func @transform_2(%arg0: i32) -> (i32, i32) {
    %c0_i32 = arith.constant 0 : i32
    %c0_i32_0 = arith.constant 0 : i32
    %c0_i32_1 = arith.constant 0 : i32
    return %c0_i32, %c0_i32_0 : i32, i32
  }
  func.func @transform_3(%arg0: i32) -> (i32, i32) {
    %c0_i32 = arith.constant 0 : i32
    %c0_i32_0 = arith.constant 0 : i32
    %c0_i32_1 = arith.constant 0 : i32
    return %c0_i32, %c0_i32_0 : i32, i32
  }
  func.func @transform_4(%arg0: i32) -> (i32, i32) {
    %c0_i32 = arith.constant 0 : i32
    %c0_i32_0 = arith.constant 0 : i32
    %c0_i32_1 = arith.constant 0 : i32
    return %c0_i32, %c0_i32_0 : i32, i32
  }
  func.func @transform_5(%arg0: i32) -> (i32, i32) {
    %c0_i32 = arith.constant 0 : i32
    %c0_i32_0 = arith.constant 0 : i32
    %c0_i32_1 = arith.constant 0 : i32
    return %c0_i32, %c0_i32_0 : i32, i32
  }
  func.func @transform_6(%arg0: i32) -> (i32, i32) {
    %c0_i32 = arith.constant 0 : i32
    %c0_i32_0 = arith.constant 0 : i32
    %c0_i32_1 = arith.constant 0 : i32
    return %c0_i32, %c0_i32_0 : i32, i32
  }
  func.func @transform_7(%arg0: i32) -> (i32, i32) {
    %c0_i32 = arith.constant 0 : i32
    %c0_i32_0 = arith.constant 0 : i32
    return %arg0, %c0_i32 : i32, i32
  }
}

</mosaic_0001>

<bundles_post_ra>
// kernel: tpu_custom_call.1
= control target key start
LH: loop header
LB: loop body
LE: loop exit
PB: predicated region body
PF: predicated region fallthrough
CT: control target
= control target key end

     0   :  { %12 = vsyncpa [#allocation3], 0  ;;  %s659_s0 = inlined_call_operand.hbm [shape: f32[8,5], index: 0, kind: input, shape index: {}]   ;;  %s660_s1 = inlined_call_operand.hbm [shape: f32[5,32], index: 1, kind: input, shape index: {}]   ;;  %s661_s2 = inlined_call_operand.vmem [shape: f32[1,32], index: 2, kind: input, shape index: {}]   ;;  %s662_s3 = inlined_call_operand.hbm [shape: f32[32,32], index: 3, kind: input, shape index: {}]   ;;  %s663_s4 = inlined_call_operand.vmem [shape: f32[1,32], index: 4, kind: input, shape index: {}]   ;;  %s664_s5 = inlined_call_operand.hbm [shape: f32[32,128], index: 5, kind: input, shape index: {}]   ;;  %s665_s6 = inlined_call_operand.vmem [shape: f32[1,128], index: 6, kind: input, shape index: {}]   ;;  %s666_s7 = inlined_call_operand.hbm [shape: f32[8,128], index: 7, kind: output, shape index: {}]  }
   0x1   :  { %13 = vsyncpa [#allocation6], 0 }
   0x2   :  { %14 = vsyncpa [#allocation9], 0 }
   0x3   :  { %15 = vsyncpa [#allocation4], 0  ;;  %s540_s24 = smov [#allocation5]   ;;  %s541_s26 = smov [#allocation2]  }
   0x4   :  { %s32_s25 = sshll.u32 %s540_s24, 4  ;;  %s22_s27 = sshll.u32 %s541_s26, 4  ;;  %s33_s25 = int_to_ptr.vmem [resolvable:$true] %s32_s25  ;;  %s23_s27 = int_to_ptr.vmem [resolvable:$true] %s22_s27 }
   0x5   :  { %s422_s30 = scalar_lea.hbm %s660_s1, 128 }
   0x6   :  { %p423_p0 = scmp.ne.s32.totalorder %s660_s1, %s422_s30  ;;  %p426_p1 = scmp.lt.u32.totalorder %s422_s30, %s660_s1 }
   0x8   :  { %p428_p2 = pnand %p426_p1, %p423_p0 }
   0xa   :  { %431 = shalt.err (!%p428_p2)
}
   0xb   :  { %s432_s12 = scalar_lea.vmem %s33_s25, 128  ;;  %p437_p4 = scmp.lt.s32.totalorder %s33_s25, %s33_s25 }
   0xc   :  { %p433_p3 = scmp.ne.s32.totalorder %s33_s25, %s432_s12  ;;  %p438_p5 = scmp.lt.s32.totalorder %s432_s12, %s432_s12 }
   0xe   :  { %p439_p6 = por %p438_p5, %p437_p4 }
  0x10   :  { %p440_p7 = pnand %p439_p6, %p433_p3 }
  0x12   :  { %443 = shalt.err (!%p440_p7)
}
  0x13   :  { %35 = dma.hbm_to_vmem [thread:$0]  %s660_s1, 128, %s33_s25, [#allocation6]  }
  0x14   :  { %s444_s17 = scalar_lea.hbm %s659_s0, 128 }
  0x15   :  { %p445_p8 = scmp.ne.s32.totalorder %s659_s0, %s444_s17  ;;  %p448_p9 = scmp.lt.u32.totalorder %s444_s17, %s659_s0 }
  0x17   :  { %p450_p10 = pnand %p448_p9, %p445_p8 }
  0x19   :  { %453 = shalt.err (!%p450_p10)
}
  0x1a   :  { %s454_s22 = scalar_lea.vmem %s23_s27, 128  ;;  %p459_p12 = scmp.lt.s32.totalorder %s23_s27, %s23_s27 }
  0x1b   :  { %p455_p11 = scmp.ne.s32.totalorder %s23_s27, %s454_s22  ;;  %p460_p13 = scmp.lt.s32.totalorder %s454_s22, %s454_s22 }
  0x1d   :  { %p461_p0 = por %p460_p13, %p459_p12 }
  0x1f   :  { %p462_p1 = pnand %p461_p0, %p455_p11 }
  0x21   :  { %465 = shalt.err (!%p462_p1)
}
  0x22   :  { %25 = dma.hbm_to_vmem [thread:$0]  %s659_s0, 128, %s23_s27, [#allocation3]  }
  0x23   :  { %s542_s24 = smov [#allocation7]   ;;  %s466_s29 = scalar_lea.hbm %s662_s3, 512 }
  0x24   :  { %s43_s25 = sshll.u32 %s542_s24, 4  ;;  %p467_p2 = scmp.ne.s32.totalorder %s662_s3, %s466_s29  ;;  %s44_s25 = int_to_ptr.vmem [resolvable:$true] %s43_s25 }
  0x25   :  { %p470_p3 = scmp.lt.u32.totalorder %s466_s29, %s662_s3 }
  0x27   :  { %p472_p4 = pnand %p470_p3, %p467_p2 }
  0x29   :  { %475 = shalt.err (!%p472_p4)
}
  0x2a   :  { %s476_s11 = scalar_lea.vmem %s44_s25, 512  ;;  %p481_p6 = scmp.lt.s32.totalorder %s44_s25, %s44_s25 }
  0x2b   :  { %p477_p5 = scmp.ne.s32.totalorder %s44_s25, %s476_s11  ;;  %p482_p7 = scmp.lt.s32.totalorder %s476_s11, %s476_s11 }
  0x2d   :  { %p483_p8 = por %p482_p7, %p481_p6 }
  0x2f   :  { %p484_p9 = pnand %p483_p8, %p477_p5 }
  0x31   :  { %487 = shalt.err (!%p484_p9)
}
  0x32   :  { %s543_s0 = smov 128   ;;  %s544_s27 = smov 8  }
  0x33   :  { %49 = dma.hbm_to_vmem [thread:$0]  %s662_s3, 512, %s44_s25, [#allocation6], %s543_s0, %s543_s0, %s544_s27  }
  0x34   :  { %s545_s14 = smov [#allocation8]   ;;  %s488_s18 = scalar_lea.hbm %s664_s5, 512 }
  0x35   :  { %s57_s15 = sshll.u32 %s545_s14, 4  ;;  %p489_p10 = scmp.ne.s32.totalorder %s664_s5, %s488_s18  ;;  %s58_s15 = int_to_ptr.vmem [resolvable:$true] %s57_s15 }
  0x36   :  { %p492_p11 = scmp.lt.u32.totalorder %s488_s18, %s664_s5 }
  0x38   :  { %p494_p12 = pnand %p492_p11, %p489_p10 }
  0x3a   :  { %497 = shalt.err (!%p494_p12)
}
  0x3b   :  { %s498_s1 = scalar_lea.vmem %s58_s15, 512  ;;  %p503_p0 = scmp.lt.s32.totalorder %s58_s15, %s58_s15 }
  0x3c   :  { %p499_p13 = scmp.ne.s32.totalorder %s58_s15, %s498_s1  ;;  %p504_p1 = scmp.lt.s32.totalorder %s498_s1, %s498_s1 }
  0x3e   :  { %p505_p2 = por %p504_p1, %p503_p0 }
  0x40   :  { %p506_p3 = pnand %p505_p2, %p499_p13 }
  0x42   :  { %509 = shalt.err (!%p506_p3)
}
  0x43   :  { %63 = dma.hbm_to_vmem [thread:$0]  %s664_s5, 512, %s58_s15, [#allocation9], %s543_s0, %s543_s0, %s544_s27  }
  0x44   :  { %532 = dma.done.wait [#allocation3], 128  }
  0x45   :  { %533 = vsyncadd [#allocation3], 4294967168 }
  0x46   :  { %534 = dma.done.wait [#allocation6], 640  }
  0x47   :  { %535 = vsyncadd [#allocation6], 4294966656 }
  0x48   :  { %536 = dma.done.wait [#allocation9], 512  }
  0x49   :  { %537 = vsyncadd [#allocation9], 4294966784  ;;  %v546_v0 = vmov 0.0   ;;  %vm547_vm0 = vmmov 0   ;;  %v548_v1 = vmov 0.0|0.0   ;;  %vm91_vm1 = vcmask 1044480  }
  0x4a   :  { %373 = vmatprep.subr.mxu0 %v546_v0  ;;  %375 = vmatprep.mubr.msk.f32.mxu0 %vm547_vm0, %v546_v0  ;;  %vm87_vm2 = vcmask 39936   ;;  %v79_v2 = vld [vmem:[#allocation5] sm:$0x1f]  ;;  %v78_v3 = vld [vmem:[#allocation2] sm:$0xff]  ;;  %v166_v4 = vld [vmem:[#allocation7] sm:$0xff]  ;;  %vm177_vm3 = vcmask 261120  }
  0x4b   :  { %400 = vmatprep.subr.bf16.mxu1 %v548_v1  ;;  %386 = vmatprep.mubr.msk.f32.mxu1 %vm547_vm0, %v546_v0  ;;  %v167_v5 = vld [vmem:[#allocation7 + $0x8] sm:$0xff]  ;;  %v168_v7 = vld [vmem:[#allocation7 + $0x10] sm:$0xff]  ;;  %v169_v8 = vld [vmem:[#allocation7 + $0x18] sm:$0xff]  ;;  %s549_s29 = smov [#allocation10]  }
  0x4c   :  { %374 = vmatpush3.msk.msra.mxu0 %vm91_vm1, %v79_v2  ;;  %v401_v6 = vpack.c.bf16 %v167_v5, %v166_v4  ;;  %v404_v9 = vpack.c.bf16 %v169_v8, %v168_v7  ;;  %v252_v10 = vld [vmem:[#allocation8] sm:$0xff]  ;;  %v253_v11 = vld [vmem:[#allocation8 + $0x8] sm:$0xff]  ;;  %v354_v13 = vld [vmem:[%s661_s2] ss:$0 sm:$0xff]  ;;  %s343_s30 = sshll.u32 %s549_s29, 4  ;;  %s344_s30 = int_to_ptr.vmem [resolvable:$true] %s343_s30 }
  0x4d   :  { %376 = vmatmul.mubr.msk.f32.vlgmr.msra.gmra.mrb[0].mxu0 %vm87_vm2, %v78_v3  ;;  %406 = vmatprep.subr.bf16.mxu0 %v548_v1  ;;  %v407_v12 = vpack.c.bf16 %v253_v11, %v252_v10  ;;  %v254_v18 = vld [vmem:[#allocation8 + $0x10] sm:$0xff]  ;;  %v255_v19 = vld [vmem:[#allocation8 + $0x18] sm:$0xff]  ;;  %s510_s8 = scalar_lea.vmem %s344_s30, 128  ;;  %p515_p5 = scmp.lt.s32.totalorder %s344_s30, %s344_s30 }
  0x4e   :  { %397 = vmatprep.mubr.msk.f32.mxu0 %vm547_vm0, %v546_v0  ;;  %402 = vmatpush3.bf16.msra.mxu1 %v401_v6  ;;  %v410_v20 = vpack.c.bf16 %v255_v19, %v254_v18  ;;  %v357_v21 = vld [vmem:[%s663_s4] ss:$0 sm:$0xff]  ;;  %p511_p4 = scmp.ne.s32.totalorder %s344_s30, %s510_s8  ;;  %p516_p6 = scmp.lt.s32.totalorder %s510_s8, %s510_s8 }
  0x4f   :  { %403 = vmatprep.subr.bf16.mxu1 %v548_v1  ;;  %408 = vmatpush3.bf16.msra.mxu0 %v407_v12  ;;  %v359_v26 = vld [vmem:[%s665_s6] ss:$0 sm:$0xff] }
  0x50   :  { %409 = vmatprep.subr.bf16.mxu0 %v548_v1  ;;  %p517_p7 = por %p516_p6, %p515_p5 }
  0x52   :  { %405 = vmatpush3.bf16.msra.mxu1 %v404_v9  ;;  %p518_p8 = pnand %p517_p7, %p511_p4 }
  0x53   :  { %411 = vmatpush3.bf16.msra.mxu0 %v410_v20 }
 0x120   :  { %v161_v14 = vpop.f32.mrb[0].mxu0 }
 0x121   :  { %v162_v15 = vadd.f32 %v354_v13, %v161_v14  ;;  %v377_v16 = vpop.f32.mrb[1].mxu0 }
 0x123   :  { %v165_v17 = vmax.f32 %v162_v15, 0.0 }
 0x125   :  { %387 = vmatmul.mubr.msk.f32.vlgmr.msra.gmra.mrb[0].mxu1 %vm177_vm3, %v165_v17 }
 0x1f8   :  { %v247_v22 = vpop.f32.mrb[0].mxu1 }
 0x1f9   :  { %v248_v23 = vadd.f32 %v357_v21, %v247_v22  ;;  %v388_v24 = vpop.f32.mrb[1].mxu1 }
 0x1fb   :  { %v251_v25 = vmax.f32 %v248_v23, 0.0 }
 0x1fd   :  { %398 = vmatmul.mubr.msk.f32.vlgmr.msra.gmra.mrb[2].mxu0 %vm177_vm3, %v251_v25 }
 0x2d0   :  { %v332_v27 = vpop.f32.mrb[2].mxu0 }
 0x2d1   :  { %v333_v28 = vadd.f32 %v359_v26, %v332_v27  ;;  %v399_v29 = vpop.f32.mrb[3].mxu0 }
 0x2d3   :  { %336 = vst [vmem:[#allocation10] sm:$0xff] %v333_v28 }
 0x2d4   :  { %521 = shalt.err (!%p518_p8)
}
 0x2d5   :  { %s522_s10 = scalar_lea.hbm %s666_s7, 128 }
 0x2d6   :  { %p523_p9 = scmp.ne.s32.totalorder %s666_s7, %s522_s10  ;;  %p526_p10 = scmp.lt.u32.totalorder %s522_s10, %s666_s7 }
 0x2d8   :  { %p528_p11 = pnand %p526_p10, %p523_p9 }
 0x2da   :  { %531 = shalt.err (!%p528_p11)
}
 0x2db   :  { %346 = dma.vmem_to_hbm [thread:$0]  %s344_s30, 128, %s666_s7, [#allocation4]  }
 0x2dc   :  { %538 = dma.done.wait [#allocation4], 128  }
 0x2dd   :  { %539 = vsyncadd [#allocation4], 4294967168 }
 0x2de   :  { %350 = vsyncpa [#allocation3], 1 }
 0x2df   :  { %351 = vsyncpa [#allocation6], 1 }
 0x2e0   :  { %352 = vsyncpa [#allocation9], 1 }
 0x2e1   :  { %353 = vsyncpa [#allocation4], 1 }

</bundles_post_ra>
